<compile_context>
chip_gen: v5e
topology: v5e:2x2
jax: 0.10.0
libtpu: 0.0.40
codegen_flags: <defaults>
</compile_context>

<pallas_src>
import jax
import jax.numpy as jnp
from jax.experimental import pallas as pl


def _round_up(x, m):
    return pl.cdiv(x, m) * m


def _siamese_fused_kernel(xl_ref, xr_ref, w1_ref, b1_ref, w2_ref, b2_ref, o_ref):
    # Shared-weight siamese tie: stack left/right batches on the row axis and
    # do a single (2B, D) @ (D, H) MXU matmul — mathematically identical to two
    # branch calls, with zero extra FLOPs.
    x = jnp.concatenate([xl_ref[...], xr_ref[...]], axis=0)
    if x.dtype != jnp.float32:
        x = x.astype(jnp.float32)
    h = jnp.dot(x, w1_ref[...], preferred_element_type=jnp.float32) + b1_ref[...]
    h = jnp.maximum(h, 0.0)  # relu (VPU)
    y = jnp.dot(h, w2_ref[...], preferred_element_type=jnp.float32) + b2_ref[...]
    # NOTE: if inputs ever become bf16, this rounds the f32 accumulator back to
    # the input dtype (intended).
    o_ref[...] = y.astype(o_ref.dtype)


def siamese_forward(in_left, in_right, w1, b1, w2, b2):
    """Returns (x1, x2) = (encode(in_left), encode(in_right)) with shared weights."""
    B, D = in_left.shape
    H = w1.shape[1]
    E = w2.shape[1]

    # Lane-dense output: pad the embedding dim to a multiple of 128 so stores
    # are unmasked. Padded W2/b2 columns are zero => extra lanes are exact
    # zeros and never affect the sliced result.
    E_pad = _round_up(E, 128)
    if E_pad != E:
        w2 = jnp.pad(w2, ((0, 0), (0, E_pad - E)))
        b2 = jnp.pad(b2, ((0, 0), (0, E_pad - E)))

    out = pl.pallas_call(
        _siamese_fused_kernel,
        out_shape=jax.ShapeDtypeStruct((2 * B, E_pad), in_left.dtype),
        # No grid: all operands are tiny and live fully in VMEM for the single
        # invocation. Scaling note: if D/H/E grow into the thousands, add a
        # batch grid axis ("parallel") and a K grid axis ("arbitrary") with an
        # f32 VMEM accumulator, and re-derive block sizes for v7x's 64 MiB VMEM
        # (set pltpu.CompilerParams(vmem_limit_bytes=...) explicitly).
    )(in_left, in_right, w1, b1, w2, b2)

    out = out[:, :E]
    return out[:B], out[B:]


def _reference(in_left, in_right, w1, b1, w2, b2):
    def enc(x):
        h = jnp.maximum(x @ w1 + b1, 0.0)
        return h @ w2 + b2
    return enc(in_left), enc(in_right)


if __name__ == "__main__":
    # Small, deterministic shapes: batch=8, in_dim=32, hidden=64, embed=32.
    B, D, H, E = 8, 32, 64, 32
    key = jax.random.PRNGKey(0)
    k_l, k_r, k_w1, k_w2 = jax.random.split(key, 4)

    in_left = jax.random.normal(k_l, (B, D), dtype=jnp.float32)
    in_right = jax.random.normal(k_r, (B, D), dtype=jnp.float32)

    # Deterministic kaiming-uniform-style init (matches the module's intent).
    lim1 = (6.0 / D) ** 0.5
    lim2 = (6.0 / H) ** 0.5
    w1 = jax.random.uniform(k_w1, (D, H), jnp.float32, -lim1, lim1)
    b1 = jnp.zeros((1, H), jnp.float32)
    w2 = jax.random.uniform(k_w2, (H, E), jnp.float32, -lim2, lim2)
    b2 = jnp.zeros((1, E), jnp.float32)

    x1, x2 = siamese_forward(in_left, in_right, w1, b1, w2, b2)
    jax.block_until_ready((x1, x2))

    r1, r2 = _reference(in_left, in_right, w1, b1, w2, b2)
    assert x1.shape == (B, E) and x2.shape == (B, E)
    assert jnp.allclose(x1, r1, atol=1e-5, rtol=1e-5), "left branch mismatch"
    assert jnp.allclose(x2, r2, atol=1e-5, rtol=1e-5), "right branch mismatch"

    # TODO(synk): the contrastive `criterion` (pairwise distance + margin loss)
    # is a training-time closure, not part of forward(); not kernelized here.
    print("KERNEL_OK")
</pallas_src>

<mosaic_0001>
module attributes {stable_mosaic.version = 11 : i64} {
  func.func @_siamese_fused_kernel(%arg0: memref<8x32xf32, #tpu.memory_space<vmem>>, %arg1: memref<8x32xf32, #tpu.memory_space<vmem>>, %arg2: memref<32x64xf32, #tpu.memory_space<vmem>>, %arg3: memref<1x64xf32, #tpu.memory_space<vmem>>, %arg4: memref<64x128xf32, #tpu.memory_space<vmem>>, %arg5: memref<1x128xf32, #tpu.memory_space<vmem>>, %arg6: memref<16x128xf32, #tpu.memory_space<vmem>>) attributes {dimension_semantics = [], scalar_prefetch = 0 : i64, scratch_operands = 0 : i64, tpu.core_type = #tpu.core_type<tc>} {
    %c0 = arith.constant 0 : index
    %c0_0 = arith.constant 0 : index
    %0 = vector.load %arg0[%c0, %c0_0] : memref<8x32xf32, #tpu.memory_space<vmem>>, vector<8x32xf32>
    %c0_1 = arith.constant 0 : index
    %c0_2 = arith.constant 0 : index
    %1 = vector.load %arg1[%c0_1, %c0_2] : memref<8x32xf32, #tpu.memory_space<vmem>>, vector<8x32xf32>
    %2 = tpu.concatenate %0, %1 in 0 : vector<8x32xf32>, vector<8x32xf32> -> vector<16x32xf32>
    %c0_3 = arith.constant 0 : index
    %c0_4 = arith.constant 0 : index
    %3 = vector.load %arg2[%c0_3, %c0_4] : memref<32x64xf32, #tpu.memory_space<vmem>>, vector<32x64xf32>
    %cst = arith.constant dense<0.000000e+00> : vector<16x64xf32>
    %4 = tpu.matmul %2, %3, %cst {dimension_numbers = #tpu.dot_dimension_numbers<[1], [0], [0], [1], [0, 0, 1, 1], [], []>} : vector<16x32xf32>, vector<32x64xf32>, vector<16x64xf32> -> vector<16x64xf32>
    %c0_5 = arith.constant 0 : index
    %c0_6 = arith.constant 0 : index
    %5 = vector.load %arg3[%c0_5, %c0_6] : memref<1x64xf32, #tpu.memory_space<vmem>>, vector<1x64xf32>
    %6 = vector.broadcast %5 : vector<1x64xf32> to vector<16x64xf32>
    %7 = arith.addf %4, %6 : vector<16x64xf32>
    %cst_7 = arith.constant 0.000000e+00 : f32
    %8 = vector.broadcast %cst_7 : f32 to vector<16x64xf32>
    %9 = arith.maximumf %7, %8 : vector<16x64xf32>
    %c0_8 = arith.constant 0 : index
    %c0_9 = arith.constant 0 : index
    %10 = vector.load %arg4[%c0_8, %c0_9] : memref<64x128xf32, #tpu.memory_space<vmem>>, vector<64x128xf32>
    %cst_10 = arith.constant dense<0.000000e+00> : vector<16x128xf32>
    %11 = tpu.matmul %9, %10, %cst_10 {dimension_numbers = #tpu.dot_dimension_numbers<[1], [0], [0], [1], [0, 0, 1, 1], [], []>} : vector<16x64xf32>, vector<64x128xf32>, vector<16x128xf32> -> vector<16x128xf32>
    %c0_11 = arith.constant 0 : index
    %c0_12 = arith.constant 0 : index
    %12 = vector.load %arg5[%c0_11, %c0_12] : memref<1x128xf32, #tpu.memory_space<vmem>>, vector<1x128xf32>
    %13 = vector.broadcast %12 : vector<1x128xf32> to vector<16x128xf32>
    %14 = arith.addf %11, %13 : vector<16x128xf32>
    %c0_13 = arith.constant 0 : index
    %c0_14 = arith.constant 0 : index
    %15 = vector.load %arg6[%c0_13, %c0_14] : memref<16x128xf32, #tpu.memory_space<vmem>>, vector<16x128xf32>
    tpu.vector_store %arg6[%c0_13, %c0_14], %14 {strides = array<i32>} : memref<16x128xf32, #tpu.memory_space<vmem>>, vector<16x128xf32>,
    return
  }
}

</mosaic_0001>

<bundles_post_ra>
// kernel: tpu_custom_call.1
= control target key start
LH: loop header
LB: loop body
LE: loop exit
PB: predicated region body
PF: predicated region fallthrough
CT: control target
= control target key end

     0   :  { %11 = vsyncpa [#allocation3], 0  ;;  %s415_s0 = inlined_call_operand.hbm [shape: f32[8,32], index: 0, kind: input, shape index: {}]   ;;  %s416_s1 = inlined_call_operand.hbm [shape: f32[8,32], index: 1, kind: input, shape index: {}]   ;;  %s417_s2 = inlined_call_operand.hbm [shape: f32[32,64], index: 2, kind: input, shape index: {}]   ;;  %s418_s3 = inlined_call_operand.vmem [shape: f32[1,64], index: 3, kind: input, shape index: {}]   ;;  %s419_s4 = inlined_call_operand.hbm [shape: f32[64,128], index: 4, kind: input, shape index: {}]   ;;  %s420_s5 = inlined_call_operand.vmem [shape: f32[1,128], index: 5, kind: input, shape index: {}]   ;;  %s421_s6 = inlined_call_operand.hbm [shape: f32[16,128], index: 6, kind: output, shape index: {}]  }
   0x1   :  { %12 = vsyncpa [#allocation6], 0 }
   0x2   :  { %13 = vsyncpa [#allocation9], 0  ;;  %s31_s23 = sshll.u32 %s416_s1, 4  ;;  %s32_s23 = int_to_ptr.hbm [resolvable:$true] %s31_s23 }
   0x3   :  { %14 = vsyncpa [#allocation4], 0  ;;  %s343_s24 = smov [#allocation5]   ;;  %s20_s28 = sshll.u32 %s415_s0, 4  ;;  %s21_s28 = int_to_ptr.hbm [resolvable:$true] %s20_s28 }
   0x4   :  { %s33_s25 = sshll.u32 %s343_s24, 4  ;;  %s344_s29 = smov [#allocation2]   ;;  %s34_s25 = int_to_ptr.vmem [resolvable:$true] %s33_s25 }
   0x5   :  { %36 = dma.hbm_to_vmem [thread:$0]  %s32_s23, 128, %s34_s25, [#allocation6]  }
   0x6   :  { %s22_s30 = sshll.u32 %s344_s29, 4  ;;  %s41_s9 = sshll.u32 %s417_s2, 4  ;;  %s23_s30 = int_to_ptr.vmem [resolvable:$true] %s22_s30  ;;  %s42_s9 = int_to_ptr.hbm [resolvable:$true] %s41_s9 }
   0x7   :  { %25 = dma.hbm_to_vmem [thread:$0]  %s21_s28, 128, %s23_s30, [#allocation3]  }
   0x8   :  { %s345_s1 = smov [#allocation7]   ;;  %s56_s13 = sshll.u32 %s419_s4, 4  ;;  %s57_s13 = int_to_ptr.hbm [resolvable:$true] %s56_s13 }
   0x9   :  { %s43_s10 = sshll.u32 %s345_s1, 4  ;;  %s346_s14 = smov 128   ;;  %s44_s10 = int_to_ptr.vmem [resolvable:$true] %s43_s10 }
   0xa   :  { %s347_s0 = smov 8   ;;  %s348_s15 = smov [#allocation8]  }
   0xb   :  { %49 = dma.hbm_to_vmem [thread:$0]  %s42_s9, 512, %s44_s10, [#allocation6], %s346_s14, %s346_s14, %s347_s0  }
   0xc   :  { %s58_s16 = sshll.u32 %s348_s15, 4  ;;  %s59_s16 = int_to_ptr.vmem [resolvable:$true] %s58_s16 }
   0xd   :  { %64 = dma.hbm_to_vmem [thread:$0]  %s57_s13, 1024, %s59_s16, [#allocation9], %s346_s14, %s346_s14, %s347_s0  }
   0xe   :  { %335 = dma.done.wait [#allocation3], 128  }
   0xf   :  { %336 = vsyncadd [#allocation3], 4294967168 }
  0x10   :  { %337 = dma.done.wait [#allocation6], 640  }
  0x11   :  { %338 = vsyncadd [#allocation6], 4294966656 }
  0x12   :  { %339 = dma.done.wait [#allocation9], 1024  }
  0x13   :  { %340 = vsyncadd [#allocation9], 4294966272  ;;  %v88_v0 = vld [vmem:[#allocation7 + $0x18] sm:$0xff]  ;;  %v87_v1 = vld [vmem:[#allocation7 + $0x10] sm:$0xff]  ;;  %vm93_vm0 = vcmask 261120   ;;  %vm137_vm1 = vcmask 523264  }
  0x14   :  { %194 = vmatpush.msra.mxu3 %v88_v0  ;;  %112 = vmatpush.msra.mxu0 %v88_v0  ;;  %v86_v2 = vld [vmem:[#allocation7 + $0x8] sm:$0xff]  ;;  %v132_v3 = vld [vmem:[#allocation8 + $0x38] sm:$0xff]  ;;  %v131_v4 = vld [vmem:[#allocation8 + $0x30] sm:$0xff]  ;;  %s349_s19 = smov [#allocation10]   ;;  %s175_s22 = sshll.u32 %s421_s6, 4  ;;  %s176_s22 = int_to_ptr.hbm [resolvable:$true] %s175_s22 }
  0x15   :  { %v85_v5 = vld [vmem:[#allocation7] sm:$0xff]  ;;  %198 = vmatpush.msra.mxu2 %v132_v3  ;;  %152 = vmatpush.msra.mxu1 %v132_v3  ;;  %v84_v6 = vld [vmem:[#allocation5] sm:$0xff]  ;;  %v83_v7 = vld [vmem:[#allocation2] sm:$0xff]  ;;  %s173_s20 = sshll.u32 %s349_s19, 4  ;;  %s174_s20 = int_to_ptr.vmem [resolvable:$true] %s173_s20 }
  0x16   :  { %195 = vmatpush.msra.mxu3 %v87_v1  ;;  %113 = vmatpush.msra.mxu0 %v87_v1  ;;  %v130_v8 = vld [vmem:[#allocation8 + $0x28] sm:$0xff]  ;;  %v129_v9 = vld [vmem:[#allocation8 + $0x20] sm:$0xff]  ;;  %v128_v10 = vld [vmem:[#allocation8 + $0x18] sm:$0xff] }
  0x17   :  { %199 = vmatpush.msra.mxu2 %v131_v4  ;;  %153 = vmatpush.msra.mxu1 %v131_v4  ;;  %v127_v11 = vld [vmem:[#allocation8 + $0x10] sm:$0xff]  ;;  %v126_v12 = vld [vmem:[#allocation8 + $0x8] sm:$0xff]  ;;  %v125_v13 = vld [vmem:[#allocation8] sm:$0xff] }
  0x18   :  { %196 = vmatpush.msra.mxu3 %v86_v2  ;;  %114 = vmatpush.msra.mxu0 %v86_v2  ;;  %v213_v14 = vld [vmem:[%s418_s3] ss:$0 sm:$0xff] }
  0x19   :  { %200 = vmatpush.msra.mxu2 %v130_v8  ;;  %154 = vmatpush.msra.mxu1 %v130_v8  ;;  %v214_v21 = vld [vmem:[%s420_s5] ss:$0 sm:$0xff] }
  0x1a   :  { %197 = vmatpush.msra.mxu3 %v85_v5  ;;  %115 = vmatpush.msra.mxu0 %v85_v5 }
  0x1b   :  { %191 = vmatmul.msk.f32.vlgmr.msra.gmra.mxu3 %vm93_vm0, %v84_v6  ;;  %190 = vmatmul.msk.f32.vlgmr.msra.gmra.mxu0 %vm93_vm0, %v83_v7 }
  0x1c   :  { %201 = vmatpush.msra.mxu2 %v129_v9  ;;  %155 = vmatpush.msra.mxu1 %v129_v9 }
  0x1e   :  { %202 = vmatpush.msra.mxu2 %v128_v10  ;;  %156 = vmatpush.msra.mxu1 %v128_v10 }
  0x20   :  { %203 = vmatpush.msra.mxu2 %v127_v11  ;;  %157 = vmatpush.msra.mxu1 %v127_v11 }
  0x22   :  { %204 = vmatpush.msra.mxu2 %v126_v12  ;;  %158 = vmatpush.msra.mxu1 %v126_v12 }
  0x24   :  { %205 = vmatpush.msra.mxu2 %v125_v13  ;;  %159 = vmatpush.msra.mxu1 %v125_v13 }
  0x98   :  { %v117_v15 = vpop.f32.mrf.mxu0 }
  0x99   :  { %v118_v16 = vadd.f32 %v213_v14, %v117_v15 }
  0x9b   :  { %v123_v17 = vmax.f32 %v118_v16, 0.0 }
  0x9d   :  { %192 = vmatmul.msk.f32.vlgmr.msra.gmra.mxu1 %vm137_vm1, %v123_v17 }
  0x9e   :  { %v120_v18 = vpop.f32.mrf.mxu3 }
  0x9f   :  { %v121_v19 = vadd.f32 %v213_v14, %v120_v18 }
  0xa1   :  { %v124_v20 = vmax.f32 %v121_v19, 0.0 }
  0xa3   :  { %193 = vmatmul.msk.f32.vlgmr.msra.gmra.mxu2 %vm137_vm1, %v124_v20 }
 0x11a   :  { %v161_v22 = vpop.f32.mrf.mxu1 }
 0x11b   :  { %v162_v23 = vadd.f32 %v214_v21, %v161_v22 }
 0x11d   :  { %167 = vst [vmem:[#allocation10] sm:$0xff] %v162_v23 }
 0x126   :  { %v164_v24 = vpop.f32.mrf.mxu2 }
 0x127   :  { %v165_v25 = vadd.f32 %v214_v21, %v164_v24 }
 0x129   :  { %168 = vst [vmem:[#allocation10 + $0x8] sm:$0xff] %v165_v25 }
 0x12a   :  { %181 = dma.vmem_to_hbm [thread:$0]  %s174_s20, 256, %s176_s22, [#allocation4], %s346_s14, %s346_s14, %s347_s0  }
 0x12b   :  { %341 = dma.done.wait [#allocation4], 256  }
 0x12c   :  { %342 = vsyncadd [#allocation4], 4294967040 }
 0x12d   :  { %186 = vsyncpa [#allocation3], 1 }
 0x12e   :  { %187 = vsyncpa [#allocation6], 1 }
 0x12f   :  { %188 = vsyncpa [#allocation9], 1 }
 0x130   :  { %189 = vsyncpa [#allocation4], 1 }

</bundles_post_ra>
